<compile_context>
chip_gen: v7x
topology: tpu7x:2x2x1
jax: 0.10.0
libtpu: 0.0.40
codegen_flags: <defaults>
</compile_context>

<pallas_src>
import functools

import jax
import jax.numpy as jnp
from jax.experimental import pallas as pl


def attention_module_kernel(x_ref, wqkv_ref, bqkv_ref, wout_ref, bout_ref,
                            lnw_ref, lnb_ref, mask_ref, o_ref, *, num_heads, eps):
    # x_ref: (N*L, E) — the whole (batch-major flattened) batch in one invocation.
    NL, E = x_ref.shape
    H = num_heads
    hd = E // H
    mdt = wqkv_ref.dtype                        # MXU operand dtype (bf16 recommended, f32 ok)

    # ---- Fused QKV projection: one MXU matmul over the whole batch. ----
    x = x_ref[...].astype(mdt)                                                  # (NL, E)
    qkv = jnp.dot(x, wqkv_ref[...], preferred_element_type=jnp.float32) \
        + bqkv_ref[...]                                                         # (NL, 3E) f32

    # ---- Head split to (H, NL, hd).  1/sqrt(hd) already folded into the Q weight/bias. ----
    def split_heads(base):
        return jnp.stack(
            [qkv[:, base + h * hd: base + (h + 1) * hd] for h in range(H)], axis=0)

    q = split_heads(0).astype(mdt)          # (H, NL, hd)
    k = split_heads(E).astype(mdt)
    v = split_heads(2 * E).astype(mdt)

    # ---- Batched-over-heads scaled-dot-product attention on the flattened batch. ----
    s = jnp.einsum('hqd,hkd->hqk', q, k, preferred_element_type=jnp.float32)    # (H, NL, NL)
    s = s + mask_ref[...]                   # block-diagonal mask: no cross-sequence attention
    s = s - jnp.max(s, axis=-1, keepdims=True)                                  # stable softmax
    p = jnp.exp(s)
    p = p * pl.reciprocal(jnp.sum(p, axis=-1, keepdims=True), approx=True)
    ctx = jnp.einsum('hqk,hkd->hqd', p.astype(mdt), v,
                     preferred_element_type=jnp.float32)                        # (H, NL, hd)

    # ---- Merge heads (lane concat -> XLU slot), then ONE (NL,E)@(E,E) output projection. ----
    ctx_m = jnp.concatenate([ctx[h] for h in range(H)], axis=-1).astype(mdt)    # (NL, E)
    out = jnp.dot(ctx_m, wout_ref[...], preferred_element_type=jnp.float32) \
        + bout_ref[...]                                                         # (NL, E) f32

    # ---- LayerNorm over the embedding dim (biased variance, eps inside rsqrt). ----
    mu = jnp.mean(out, axis=-1, keepdims=True)
    xc = out - mu
    var = jnp.mean(xc * xc, axis=-1, keepdims=True)
    y = xc * jax.lax.rsqrt(var + eps)
    y = y * lnw_ref[...] + lnb_ref[...]

    # Dropout: identity in eval mode.
    o_ref[...] = y.astype(o_ref.dtype)


def attention_module(x, params, num_heads, eps=1e-5, matmul_dtype=jnp.bfloat16):
    """x: (L, N, E) float32, seq-first like the PyTorch module (eval / inference)."""
    L, N, E = x.shape
    hd = E // num_heads
    NL = N * L

    # Batch-major flattening: one matmul row per (n, l) token.
    x2 = jnp.transpose(x, (1, 0, 2)).reshape(NL, E)

    # Static weight prep in XLA (free at runtime):
    #   * fused QKV weight pre-transposed to (E, 3E) so the kernel never transposes,
    #   * 1/sqrt(hd) folded into the Q columns / Q bias slice,
    #   * out_proj weight pre-transposed to (E, E),
    #   * block-diagonal additive mask keeping the flattened sequences independent.
    col_scale = jnp.concatenate([jnp.full((E,), 1.0 / (hd ** 0.5), jnp.float32),
                                 jnp.ones((2 * E,), jnp.float32)])
    w_qkv_t = (params["in_w"].T * col_scale[None, :]).astype(matmul_dtype)      # (E, 3E)
    b_qkv = (params["in_b"] * col_scale[None, :]).astype(jnp.float32)           # (1, 3E)
    w_out_t = params["out_w"].T.astype(matmul_dtype)                            # (E, E)
    batch_id = jnp.repeat(jnp.arange(N, dtype=jnp.int32), L)                    # (NL,)
    mask = jnp.where(batch_id[:, None] == batch_id[None, :], 0.0,
                     -1e30).astype(jnp.float32)                                 # (NL, NL)

    kernel = functools.partial(attention_module_kernel, num_heads=num_heads, eps=eps)
    out = pl.pallas_call(
        kernel,
        out_shape=jax.ShapeDtypeStruct((NL, E), jnp.float32),
        # No grid: single invocation, whole arrays resident in VMEM (tiny footprint here).
    )(x2, w_qkv_t, b_qkv, w_out_t, params["out_b"], params["ln_w"], params["ln_b"], mask)

    return jnp.transpose(out.reshape(N, L, E), (1, 0, 2))                       # back to (L, N, E)


def reference(x, params, num_heads, eps=1e-5):
    """Pure-JAX reference matching nn.MultiheadAttention + nn.LayerNorm (eval)."""
    L, N, E = x.shape
    hd = E // num_heads
    x2 = x.reshape(L * N, E)
    qkv = x2 @ params["in_w"].T + params["in_b"][0]
    q, k, v = qkv[:, :E], qkv[:, E:2 * E], qkv[:, 2 * E:]

    def split(t):  # (L*N, E) -> (N, H, L, hd)
        return t.reshape(L, N, num_heads, hd).transpose(1, 2, 0, 3)

    qh, kh, vh = split(q), split(k), split(v)
    s = jnp.einsum("bhld,bhmd->bhlm", qh, kh) / (hd ** 0.5)
    p = jax.nn.softmax(s, axis=-1)
    ctx = jnp.einsum("bhlm,bhmd->bhld", p, vh)
    ctx = ctx.transpose(2, 0, 1, 3).reshape(L, N, E)
    out = ctx @ params["out_w"].T + params["out_b"][0]
    mu = out.mean(-1, keepdims=True)
    var = ((out - mu) ** 2).mean(-1, keepdims=True)
    return (out - mu) / jnp.sqrt(var + eps) * params["ln_w"][0] + params["ln_b"][0]


if __name__ == "__main__":
    L, N, E, H = 8, 2, 32, 4            # seq, batch, d_model, num_heads
    key = jax.random.PRNGKey(0)
    kx, k1, k2, k3, k4, k5, k6 = jax.random.split(key, 7)

    x = jax.random.normal(kx, (L, N, E), dtype=jnp.float32)

    params = {
        "in_w":  (jax.random.normal(k1, (3 * E, E), dtype=jnp.float32) * 0.05),
        "in_b":  (jax.random.normal(k2, (1, 3 * E), dtype=jnp.float32) * 0.02),
        "out_w": (jax.random.normal(k3, (E, E), dtype=jnp.float32) * 0.05),
        "out_b": (jax.random.normal(k4, (1, E), dtype=jnp.float32) * 0.02),
        "ln_w":  (1.0 + 0.1 * jax.random.normal(k5, (1, E), dtype=jnp.float32)),
        "ln_b":  (0.05 * jax.random.normal(k6, (1, E), dtype=jnp.float32)),
    }

    y_ref = reference(x, params, num_heads=H)

    # f32 MXU operands: tight check (only approximation is the EUP softmax reciprocal).
    y = attention_module(x, params, num_heads=H, matmul_dtype=jnp.float32)
    y = jax.block_until_ready(y)
    assert y.shape == (L, N, E)
    assert jnp.allclose(y, y_ref, atol=5e-3, rtol=5e-3), "f32 mismatch vs reference"

    # bf16 MXU operands: recommended production setting on v5e / v6e / v7x (sanity check only).
    y_bf16 = attention_module(x, params, num_heads=H, matmul_dtype=jnp.bfloat16)
    y_bf16 = jax.block_until_ready(y_bf16)
    assert jnp.allclose(y_bf16, y_ref, atol=1e-1, rtol=1e-1), "bf16 sanity check failed"

    print("KERNEL_OK")
</pallas_src>

<mosaic_0001>
module attributes {stable_mosaic.version = 11 : i64} {
  func.func @attention_module_kernel(%arg0: memref<16x32xf32, #tpu.memory_space<vmem>>, %arg1: memref<32x96xf32, #tpu.memory_space<vmem>>, %arg2: memref<1x96xf32, #tpu.memory_space<vmem>>, %arg3: memref<32x32xf32, #tpu.memory_space<vmem>>, %arg4: memref<1x32xf32, #tpu.memory_space<vmem>>, %arg5: memref<1x32xf32, #tpu.memory_space<vmem>>, %arg6: memref<1x32xf32, #tpu.memory_space<vmem>>, %arg7: memref<16x16xf32, #tpu.memory_space<vmem>>, %arg8: memref<16x32xf32, #tpu.memory_space<vmem>>) attributes {dimension_semantics = [], scalar_prefetch = 0 : i64, scratch_operands = 0 : i64, tpu.core_type = #tpu.core_type<tc>} {
    %c0 = arith.constant 0 : index
    %c0_0 = arith.constant 0 : index
    %0 = vector.load %arg0[%c0, %c0_0] : memref<16x32xf32, #tpu.memory_space<vmem>>, vector<16x32xf32>
    %c0_1 = arith.constant 0 : index
    %c0_2 = arith.constant 0 : index
    %1 = vector.load %arg1[%c0_1, %c0_2] : memref<32x96xf32, #tpu.memory_space<vmem>>, vector<32x96xf32>
    %cst = arith.constant dense<0.000000e+00> : vector<16x96xf32>
    %2 = tpu.matmul %0, %1, %cst {dimension_numbers = #tpu.dot_dimension_numbers<[1], [0], [0], [1], [0, 0, 1, 1], [], []>} : vector<16x32xf32>, vector<32x96xf32>, vector<16x96xf32> -> vector<16x96xf32>
    %c0_3 = arith.constant 0 : index
    %c0_4 = arith.constant 0 : index
    %3 = vector.load %arg2[%c0_3, %c0_4] : memref<1x96xf32, #tpu.memory_space<vmem>>, vector<1x96xf32>
    %4 = vector.broadcast %3 : vector<1x96xf32> to vector<16x96xf32>
    %5 = arith.addf %2, %4 : vector<16x96xf32>
    %6 = vector.extract_strided_slice %5 {offsets = [0, 0], sizes = [16, 8], strides = [1, 1]} : vector<16x96xf32> to vector<16x8xf32>
    %7 = vector.extract_strided_slice %5 {offsets = [0, 8], sizes = [16, 8], strides = [1, 1]} : vector<16x96xf32> to vector<16x8xf32>
    %8 = vector.extract_strided_slice %5 {offsets = [0, 16], sizes = [16, 8], strides = [1, 1]} : vector<16x96xf32> to vector<16x8xf32>
    %9 = vector.extract_strided_slice %5 {offsets = [0, 24], sizes = [16, 8], strides = [1, 1]} : vector<16x96xf32> to vector<16x8xf32>
    %10 = vector.shape_cast %6 : vector<16x8xf32> to vector<1x16x8xf32>
    %11 = vector.shape_cast %7 : vector<16x8xf32> to vector<1x16x8xf32>
    %12 = vector.shape_cast %8 : vector<16x8xf32> to vector<1x16x8xf32>
    %13 = vector.shape_cast %9 : vector<16x8xf32> to vector<1x16x8xf32>
    %14 = tpu.concatenate %10, %11, %12, %13 in 0 : vector<1x16x8xf32>, vector<1x16x8xf32>, vector<1x16x8xf32>, vector<1x16x8xf32> -> vector<4x16x8xf32>
    %15 = vector.extract_strided_slice %5 {offsets = [0, 32], sizes = [16, 8], strides = [1, 1]} : vector<16x96xf32> to vector<16x8xf32>
    %16 = vector.extract_strided_slice %5 {offsets = [0, 40], sizes = [16, 8], strides = [1, 1]} : vector<16x96xf32> to vector<16x8xf32>
    %17 = vector.extract_strided_slice %5 {offsets = [0, 48], sizes = [16, 8], strides = [1, 1]} : vector<16x96xf32> to vector<16x8xf32>
    %18 = vector.extract_strided_slice %5 {offsets = [0, 56], sizes = [16, 8], strides = [1, 1]} : vector<16x96xf32> to vector<16x8xf32>
    %19 = vector.shape_cast %15 : vector<16x8xf32> to vector<1x16x8xf32>
    %20 = vector.shape_cast %16 : vector<16x8xf32> to vector<1x16x8xf32>
    %21 = vector.shape_cast %17 : vector<16x8xf32> to vector<1x16x8xf32>
    %22 = vector.shape_cast %18 : vector<16x8xf32> to vector<1x16x8xf32>
    %23 = tpu.concatenate %19, %20, %21, %22 in 0 : vector<1x16x8xf32>, vector<1x16x8xf32>, vector<1x16x8xf32>, vector<1x16x8xf32> -> vector<4x16x8xf32>
    %24 = vector.extract_strided_slice %5 {offsets = [0, 64], sizes = [16, 8], strides = [1, 1]} : vector<16x96xf32> to vector<16x8xf32>
    %25 = vector.extract_strided_slice %5 {offsets = [0, 72], sizes = [16, 8], strides = [1, 1]} : vector<16x96xf32> to vector<16x8xf32>
    %26 = vector.extract_strided_slice %5 {offsets = [0, 80], sizes = [16, 8], strides = [1, 1]} : vector<16x96xf32> to vector<16x8xf32>
    %27 = vector.extract_strided_slice %5 {offsets = [0, 88], sizes = [16, 8], strides = [1, 1]} : vector<16x96xf32> to vector<16x8xf32>
    %28 = vector.shape_cast %24 : vector<16x8xf32> to vector<1x16x8xf32>
    %29 = vector.shape_cast %25 : vector<16x8xf32> to vector<1x16x8xf32>
    %30 = vector.shape_cast %26 : vector<16x8xf32> to vector<1x16x8xf32>
    %31 = vector.shape_cast %27 : vector<16x8xf32> to vector<1x16x8xf32>
    %32 = tpu.concatenate %28, %29, %30, %31 in 0 : vector<1x16x8xf32>, vector<1x16x8xf32>, vector<1x16x8xf32>, vector<1x16x8xf32> -> vector<4x16x8xf32>
    "tpu.trace_start"() <{level = 10 : i32, message = "hqd,hkd->hqk"}> : () -> ()
    %cst_5 = arith.constant dense<0.000000e+00> : vector<4x16x16xf32>
    %33 = tpu.matmul %14, %23, %cst_5 {dimension_numbers = #tpu.dot_dimension_numbers<[2], [2], [1], [1], [0, 0, 0, 1, 1, 1], [0], [0]>} : vector<4x16x8xf32>, vector<4x16x8xf32>, vector<4x16x16xf32> -> vector<4x16x16xf32>
    "tpu.trace_stop"() : () -> ()
    %c0_6 = arith.constant 0 : index
    %c0_7 = arith.constant 0 : index
    %34 = vector.load %arg7[%c0_6, %c0_7] : memref<16x16xf32, #tpu.memory_space<vmem>>, vector<16x16xf32>
    %35 = vector.shape_cast %34 : vector<16x16xf32> to vector<1x16x16xf32>
    %36 = vector.broadcast %35 : vector<1x16x16xf32> to vector<4x16x16xf32>
    %37 = arith.addf %33, %36 : vector<4x16x16xf32>
    %cst_8 = arith.constant dense<0xFF800000> : vector<4x16xf32>
    %38 = vector.multi_reduction <maximumf>, %37, %cst_8 [2] : vector<4x16x16xf32> to vector<4x16xf32>
    %39 = vector.shape_cast %38 : vector<4x16xf32> to vector<4x16x1xf32>
    %40 = vector.broadcast %39 : vector<4x16x1xf32> to vector<4x16x16xf32>
    %41 = arith.subf %37, %40 : vector<4x16x16xf32>
    %42 = math.exp %41 : vector<4x16x16xf32>
    %cst_9 = arith.constant dense<0.000000e+00> : vector<4x16xf32>
    %43 = vector.multi_reduction <add>, %42, %cst_9 [2] : vector<4x16x16xf32> to vector<4x16xf32>
    %44 = vector.shape_cast %43 : vector<4x16xf32> to vector<4x16x1xf32>
    %45 = tpu.reciprocal %44 {approx = true} : vector<4x16x1xf32> -> vector<4x16x1xf32>
    %46 = vector.broadcast %45 : vector<4x16x1xf32> to vector<4x16x16xf32>
    %47 = arith.mulf %42, %46 : vector<4x16x16xf32>
    "tpu.trace_start"() <{level = 10 : i32, message = "hqk,hkd->hqd"}> : () -> ()
    %cst_10 = arith.constant dense<0.000000e+00> : vector<4x16x8xf32>
    %48 = tpu.matmul %47, %32, %cst_10 {dimension_numbers = #tpu.dot_dimension_numbers<[2], [1], [1], [2], [0, 0, 0, 1, 1, 2], [0], [0]>} : vector<4x16x16xf32>, vector<4x16x8xf32>, vector<4x16x8xf32> -> vector<4x16x8xf32>
    "tpu.trace_stop"() : () -> ()
    %49 = vector.extract_strided_slice %48 {offsets = [0, 0, 0], sizes = [1, 16, 8], strides = [1, 1, 1]} : vector<4x16x8xf32> to vector<1x16x8xf32>
    %50 = vector.shape_cast %49 : vector<1x16x8xf32> to vector<16x8xf32>
    %51 = vector.extract_strided_slice %48 {offsets = [1, 0, 0], sizes = [1, 16, 8], strides = [1, 1, 1]} : vector<4x16x8xf32> to vector<1x16x8xf32>
    %52 = vector.shape_cast %51 : vector<1x16x8xf32> to vector<16x8xf32>
    %53 = vector.extract_strided_slice %48 {offsets = [2, 0, 0], sizes = [1, 16, 8], strides = [1, 1, 1]} : vector<4x16x8xf32> to vector<1x16x8xf32>
    %54 = vector.shape_cast %53 : vector<1x16x8xf32> to vector<16x8xf32>
    %55 = vector.extract_strided_slice %48 {offsets = [3, 0, 0], sizes = [1, 16, 8], strides = [1, 1, 1]} : vector<4x16x8xf32> to vector<1x16x8xf32>
    %56 = vector.shape_cast %55 : vector<1x16x8xf32> to vector<16x8xf32>
    %57 = tpu.concatenate %50, %52, %54, %56 in 1 : vector<16x8xf32>, vector<16x8xf32>, vector<16x8xf32>, vector<16x8xf32> -> vector<16x32xf32>
    %c0_11 = arith.constant 0 : index
    %c0_12 = arith.constant 0 : index
    %58 = vector.load %arg3[%c0_11, %c0_12] : memref<32x32xf32, #tpu.memory_space<vmem>>, vector<32x32xf32>
    %cst_13 = arith.constant dense<0.000000e+00> : vector<16x32xf32>
    %59 = tpu.matmul %57, %58, %cst_13 {dimension_numbers = #tpu.dot_dimension_numbers<[1], [0], [0], [1], [0, 0, 1, 1], [], []>} : vector<16x32xf32>, vector<32x32xf32>, vector<16x32xf32> -> vector<16x32xf32>
    %c0_14 = arith.constant 0 : index
    %c0_15 = arith.constant 0 : index
    %60 = vector.load %arg4[%c0_14, %c0_15] : memref<1x32xf32, #tpu.memory_space<vmem>>, vector<1x32xf32>
    %61 = vector.broadcast %60 : vector<1x32xf32> to vector<16x32xf32>
    %62 = arith.addf %59, %61 : vector<16x32xf32>
    %cst_16 = arith.constant dense<0.000000e+00> : vector<16xf32>
    %63 = vector.multi_reduction <add>, %62, %cst_16 [1] : vector<16x32xf32> to vector<16xf32>
    %64 = vector.shape_cast %63 : vector<16xf32> to vector<16x1xf32>
    %cst_17 = arith.constant 3.200000e+01 : f32
    %65 = vector.broadcast %cst_17 : f32 to vector<16x1xf32>
    %66 = arith.divf %64, %65 : vector<16x1xf32>
    %67 = vector.broadcast %66 : vector<16x1xf32> to vector<16x32xf32>
    %68 = arith.subf %62, %67 : vector<16x32xf32>
    %69 = arith.mulf %68, %68 : vector<16x32xf32>
    %cst_18 = arith.constant dense<0.000000e+00> : vector<16xf32>
    %70 = vector.multi_reduction <add>, %69, %cst_18 [1] : vector<16x32xf32> to vector<16xf32>
    %71 = vector.shape_cast %70 : vector<16xf32> to vector<16x1xf32>
    %cst_19 = arith.constant 3.200000e+01 : f32
    %72 = vector.broadcast %cst_19 : f32 to vector<16x1xf32>
    %73 = arith.divf %71, %72 : vector<16x1xf32>
    %cst_20 = arith.constant 9.99999974E-6 : f32
    %74 = vector.broadcast %cst_20 : f32 to vector<16x1xf32>
    %75 = arith.addf %73, %74 : vector<16x1xf32>
    %76 = math.rsqrt %75 : vector<16x1xf32>
    %77 = vector.broadcast %76 : vector<16x1xf32> to vector<16x32xf32>
    %78 = arith.mulf %68, %77 : vector<16x32xf32>
    %c0_21 = arith.constant 0 : index
    %c0_22 = arith.constant 0 : index
    %79 = vector.load %arg5[%c0_21, %c0_22] : memref<1x32xf32, #tpu.memory_space<vmem>>, vector<1x32xf32>
    %80 = vector.broadcast %79 : vector<1x32xf32> to vector<16x32xf32>
    %81 = arith.mulf %78, %80 : vector<16x32xf32>
    %c0_23 = arith.constant 0 : index
    %c0_24 = arith.constant 0 : index
    %82 = vector.load %arg6[%c0_23, %c0_24] : memref<1x32xf32, #tpu.memory_space<vmem>>, vector<1x32xf32>
    %83 = vector.broadcast %82 : vector<1x32xf32> to vector<16x32xf32>
    %84 = arith.addf %81, %83 : vector<16x32xf32>
    %c0_25 = arith.constant 0 : index
    %c0_26 = arith.constant 0 : index
    %85 = vector.load %arg8[%c0_25, %c0_26] : memref<16x32xf32, #tpu.memory_space<vmem>>, vector<16x32xf32>
    tpu.vector_store %arg8[%c0_25, %c0_26], %84 {strides = array<i32>} : memref<16x32xf32, #tpu.memory_space<vmem>>, vector<16x32xf32>,
    return
  }
}

</mosaic_0001>

<bundles_post_ra>
// kernel: tpu_custom_call.1
= control target key start
LH: loop header
LB: loop body
LE: loop exit
PB: predicated region body
PF: predicated region fallthrough
CT: control target
= control target key end

     0   :  { %13 = vsyncpa [#allocation3], 0  ;;  %s1794_s0 = inlined_call_operand.hbm [shape: f32[16,32], index: 0, kind: input, shape index: {}]   ;;  %s1795_s1 = inlined_call_operand.hbm [shape: f32[32,96], index: 1, kind: input, shape index: {}]   ;;  %s1796_s2 = inlined_call_operand.vmem [shape: f32[1,96], index: 2, kind: input, shape index: {}]   ;;  %s1797_s3 = inlined_call_operand.hbm [shape: f32[32,32], index: 3, kind: input, shape index: {}]   ;;  %s1798_s4 = inlined_call_operand.vmem [shape: f32[1,32], index: 4, kind: input, shape index: {}]   ;;  %s1799_s5 = inlined_call_operand.vmem [shape: f32[1,32], index: 5, kind: input, shape index: {}]   ;;  %s1800_s6 = inlined_call_operand.vmem [shape: f32[1,32], index: 6, kind: input, shape index: {}]   ;;  %s1801_s7 = inlined_call_operand.vmem [shape: f32[16,16], index: 7, kind: input, shape index: {}]   ;;  %s1802_s8 = inlined_call_operand.hbm [shape: f32[16,32], index: 8, kind: output, shape index: {}]  }
   0x1   :  { %14 = vsyncpa [#allocation6], 0 }
   0x2   :  { %15 = vsyncpa [#allocation4], 0  ;;  %s1549_s27 = smov [#allocation5]   ;;  %s1550_s29 = smov [#allocation2]  }
   0x3   :  { %s33_s28 = sshll.u32 %s1549_s27, 4  ;;  %s21_s30 = sshll.u32 %s1550_s29, 4  ;;  %s34_s28 = int_to_ptr.vmem [resolvable:$true] %s33_s28  ;;  %s1607_s30 = int_to_ptr.vmem [resolvable:$true] %s21_s30 }
   0x4   :  { %s1455_s11 = scalar_lea.hbm %s1795_s1, 512 }
   0x5   :  { %p1456_p0 = scmp.ne.s32.totalorder %s1795_s1, %s1455_s11  ;;  %p1459_p1 = scmp.lt.u32.totalorder %s1455_s11, %s1795_s1 }
   0x7   :  { %p1461_p2 = pnand %p1459_p1, %p1456_p0 }
   0x9   :  { %1464 = shalt.err (!%p1461_p2)
}
   0xa   :  { %s1465_s16 = scalar_lea.vmem %s34_s28, 512  ;;  %p1470_p4 = scmp.lt.s32.totalorder %s34_s28, %s34_s28 }
   0xb   :  { %p1466_p3 = scmp.ne.s32.totalorder %s34_s28, %s1465_s16  ;;  %p1471_p5 = scmp.lt.s32.totalorder %s1465_s16, %s1465_s16 }
   0xd   :  { %p1472_p6 = por %p1471_p5, %p1470_p4 }
   0xf   :  { %p1473_p7 = pnand %p1472_p6, %p1466_p3 }
  0x11   :  { %1476 = shalt.err (!%p1473_p7)
}
  0x12   :  { %s1551_s17 = smov 128   ;;  %s1552_s18 = smov 8  }
  0x13   :  { %39 = dma.hbm_to_vmem [thread:$0]  %s1795_s1, 512, %s34_s28, [#allocation6], %s1551_s17, %s1551_s17, %s1552_s18  }
  0x14   :  { %s1477_s23 = scalar_lea.hbm %s1794_s0, 256 }
  0x15   :  { %p1478_p8 = scmp.ne.s32.totalorder %s1794_s0, %s1477_s23  ;;  %p1481_p9 = scmp.lt.u32.totalorder %s1477_s23, %s1794_s0 }
  0x17   :  { %p1483_p10 = pnand %p1481_p9, %p1478_p8 }
  0x19   :  { %1486 = shalt.err (!%p1483_p10)
}
  0x1a   :  { %s1487_s29 = scalar_lea.vmem %s1607_s30, 256  ;;  %p1492_p12 = scmp.lt.s32.totalorder %s1607_s30, %s1607_s30 }
  0x1b   :  { %p1488_p11 = scmp.ne.s32.totalorder %s1607_s30, %s1487_s29  ;;  %p1493_p13 = scmp.lt.s32.totalorder %s1487_s29, %s1487_s29 }
  0x1d   :  { %p1494_p0 = por %p1493_p13, %p1492_p12 }
  0x1f   :  { %p1495_p1 = pnand %p1494_p0, %p1488_p11 }
  0x21   :  { %1498 = shalt.err (!%p1495_p1)
}
  0x22   :  { %27 = dma.hbm_to_vmem [thread:$0]  %s1794_s0, 256, %s1607_s30, [#allocation3], %s1551_s17, %s1551_s17, %s1552_s18  }
  0x23   :  { %s1553_s9 = smov [#allocation7]   ;;  %s1499_s13 = scalar_lea.hbm %s1797_s3, 512 }
  0x24   :  { %s47_s10 = sshll.u32 %s1553_s9, 4  ;;  %p1500_p2 = scmp.ne.s32.totalorder %s1797_s3, %s1499_s13  ;;  %s48_s10 = int_to_ptr.vmem [resolvable:$true] %s47_s10 }
  0x25   :  { %p1503_p3 = scmp.lt.u32.totalorder %s1499_s13, %s1797_s3 }
  0x27   :  { %p1505_p4 = pnand %p1503_p3, %p1500_p2 }
  0x29   :  { %1508 = shalt.err (!%p1505_p4)
}
  0x2a   :  { %s1509_s20 = scalar_lea.vmem %s48_s10, 512  ;;  %p1514_p6 = scmp.lt.s32.totalorder %s48_s10, %s48_s10 }
  0x2b   :  { %p1510_p5 = scmp.ne.s32.totalorder %s48_s10, %s1509_s20  ;;  %p1515_p7 = scmp.lt.s32.totalorder %s1509_s20, %s1509_s20 }
  0x2d   :  { %p1516_p8 = por %p1515_p7, %p1514_p6 }
  0x2f   :  { %p1517_p9 = pnand %p1516_p8, %p1510_p5 }
  0x31   :  { %1520 = shalt.err (!%p1517_p9)
}
  0x32   :  { %53 = dma.hbm_to_vmem [thread:$0]  %s1797_s3, 512, %s48_s10, [#allocation6], %s1551_s17, %s1551_s17, %s1552_s18  }
  0x33   :  { %1543 = dma.done.wait [#allocation3], 256  }
  0x34   :  { %1544 = vsyncadd [#allocation3], 4294967040 }
  0x35   :  { %1545 = dma.done.wait [#allocation6], 1024  }
  0x36   :  { %1546 = vsyncadd [#allocation6], 4294966272  ;;  %vm84_vm0 = vcmask 261120   ;;  %v73_v0 = vld [vmem:[#allocation5] sm:$0xff]  ;;  %v74_v1 = vld [vmem:[#allocation5 + $0x8] sm:$0xff]  ;;  %vm186_vm1 = vcmask 64512  }
  0x37   :  { %v75_v2 = vld [vmem:[#allocation5 + $0x10] sm:$0xff]  ;;  %v1310_v3 = vpack.c.bf16 %v74_v1, %v73_v0  ;;  %v76_v4 = vld [vmem:[#allocation5 + $0x18] sm:$0xff]  ;;  %s1554_s22 = smov 112   ;;  %s1555_s23 = smov 120   ;;  %vm1680_vm2 = vmpackc.low %vm186_vm1, %vm186_vm1  ;;  %vm531_vm3 = vcmask 130048   ;;  %vm996_vm4 = vcmask 195584  }
  0x38   :  { %v71_v5 = vld [vmem:[#allocation2] sm:$0xff]  ;;  %v1314_v6 = vpack.c.bf16 %v76_v4, %v75_v2  ;;  %v72_v7 = vld [vmem:[#allocation2 + $0x8] sm:$0xff]  ;;  %s1556_s24 = smov 104   ;;  %s1557_s25 = smov 96  }
  0x39   :  { %1240 = vmatprep.mubr.msk.f32.mxu0 %vm84_vm0, %v71_v5  ;;  %1311 = vmatprep.subr.bf16.mxu0 %v1310_v3  ;;  %v1156_v8 = vld [vmem:[%s1796_s2] ss:$0 sm:$0xff]  ;;  %v181_v40 = vld [vmem:[%s1801_s7 + $0x8] sm:$0xff]  ;;  %s1559_s1 = smov 16   ;;  %s1560_s28 = smov 24  }
  0x3a   :  { %1313 = vmatpush3.bf16.msra.mxu0 %v1310_v3  ;;  %v180_v41 = vld [vmem:[%s1801_s7] sm:$0xff]  ;;  %s1558_s7 = smov 64   ;;  %s1561_s14 = smov [#allocation8]  }
  0x3b   :  { %1315 = vmatprep.subr.bf16.mxu0 %v1314_v6  ;;  %s1143_s15 = sshll.u32 %s1561_s14, 4  ;;  %s1144_s15 = int_to_ptr.vmem [resolvable:$true] %s1143_s15 }
  0x3c   :  { %s1521_s16 = scalar_lea.vmem %s1144_s15, 256  ;;  %p1526_p11 = scmp.lt.s32.totalorder %s1144_s15, %s1144_s15 }
  0x3d   :  { %p1522_p10 = scmp.ne.s32.totalorder %s1144_s15, %s1521_s16  ;;  %p1527_p12 = scmp.lt.s32.totalorder %s1521_s16, %s1521_s16 }
  0x3e   :  { %1317 = vmatpush3.bf16.msra.mxu0 %v1314_v6 }
  0x3f   :  { %p1528_p13 = por %p1527_p12, %p1526_p11 }
  0x41   :  { %1241 = vmatmul.mubr.msk.f32.vlgmr.msra.gmra.mrb[0].mxu0 %vm84_vm0, %v72_v7  ;;  %p1529_p0 = pnand %p1528_p13, %p1522_p10 }
 0x114   :  { %v1242_v9 = vpop.f32.mrb[0].mxu0 }
 0x115   :  { %v163_v10 = vadd.f32 %v1242_v9, %v1156_v8  ;;  %v157_v11 = vpop.f32.mrb[1].mxu0 }
 0x116   :  { %v158_v12 = vadd.f32 %v1156_v8, %v157_v11 }
 0x117   :  { %174 = vrot.lane.b32.xlu1 %v163_v10, %s1554_s22 }
 0x118   :  { %168 = vrot.lane.b32.xlu0 %v158_v12, %s1555_s23  ;;  %1247 = vmatprep.mubr.msk.f32.mxu1 %vm186_vm1, %v158_v12  ;;  %v1665_v13 = vpack.i.bf16 %v163_v10, %v158_v12 }
 0x11b   :  { %172 = vrot.lane.b32.xlu1 %v158_v12, %s1554_s22 }
 0x11c   :  { %170 = vrot.lane.b32.xlu0 %v163_v10, %s1555_s23 }
 0x11f   :  { %178 = vrot.lane.b32.xlu1 %v163_v10, %s1556_s24 }
 0x120   :  { %176 = vrot.lane.b32.xlu0 %v158_v12, %s1556_s24 }
 0x124   :  { %1380 = vrot.lane.b32.xlu0 %v1665_v13, %s1557_s25 }
 0x189   :  { %v175_v14 = vpop.permute.xlu1 %174 }
 0x18a   :  { %v169_v15 = vpop.permute.xlu0 %168 }
 0x18b   :  { %1254 = vmatprep.mubr.msk.f32.mxu0 %vm186_vm1, %v169_v15 }
 0x18d   :  { %v173_v16 = vpop.permute.xlu1 %172 }
 0x18e   :  { %v1669_v17 = vpack.i.bf16 %v175_v14, %v173_v16  ;;  %v171_v18 = vpop.permute.xlu0 %170 }
 0x18f   :  { %v1671_v19 = vpack.i.bf16 %v171_v18, %v169_v15 }
 0x190   :  { %1390 = vrot.lane.b32.xlu0 %v1669_v17, %s1557_s25 }
 0x191   :  { %v179_v20 = vpop.permute.xlu1 %178  ;;  %1385 = vrot.lane.b32.xlu1 %v1671_v19, %s1557_s25 }
 0x192   :  { %v177_v21 = vpop.permute.xlu0 %176 }
 0x193   :  { %v1675_v22 = vpack.i.bf16 %v179_v20, %v177_v21 }
 0x195   :  { %1395 = vrot.lane.b32.xlu1 %v1675_v22, %s1557_s25 }
 0x196   :  { %v1381_v23 = vpop.permute.xlu0 %1380 }
 0x197   :  { %v1383_v24 = vunpack.i.h.bf16 %v1381_v23  ;;  %v1382_v25 = vunpack.i.l.bf16 %v1381_v23 }
 0x199   :  { %v1318_v27 = vpack.c.bf16 %v1383_v24, %v1382_v25 }
 0x19b   :  { %1320 = vmatprep.subr.msk.bf16.mxu1 %vm1680_vm2, %v1318_v27 }
 0x19c   :  { %1323 = vmatpush3.bf16.xpose.msk.msra.mxu1 %vm1680_vm2, %v1318_v27 }
 0x1a3   :  { %1248 = vmatmul.mubr.msk.f32.vlgmr.msra.gmra.mrb[0].mxu1 %vm186_vm1, %v163_v10 }
 0x1a4   :  { %1261 = vmatprep.mubr.msk.f32.mxu1 %vm186_vm1, %v173_v16 }
 0x202   :  { %v1391_v28 = vpop.permute.xlu0 %1390 }
 0x203   :  { %v1393_v29 = vunpack.i.h.bf16 %v1391_v28  ;;  %v1392_v30 = vunpack.i.l.bf16 %v1391_v28  ;;  %v1386_v31 = vpop.permute.xlu1 %1385 }
 0x204   :  { %v1388_v32 = vunpack.i.h.bf16 %v1386_v31  ;;  %v1387_v33 = vunpack.i.l.bf16 %v1386_v31 }
 0x205   :  { %v1330_v34 = vpack.c.bf16 %v1393_v29, %v1392_v30 }
 0x206   :  { %v1324_v35 = vpack.c.bf16 %v1388_v32, %v1387_v33 }
 0x207   :  { %v1396_v36 = vpop.permute.xlu1 %1395  ;;  %1332 = vmatprep.subr.msk.bf16.mxu1 %vm1680_vm2, %v1330_v34 }
 0x208   :  { %v1398_v37 = vunpack.i.h.bf16 %v1396_v36  ;;  %v1397_v38 = vunpack.i.l.bf16 %v1396_v36  ;;  %1326 = vmatprep.subr.msk.bf16.mxu0 %vm1680_vm2, %v1324_v35  ;;  %1335 = vmatpush3.bf16.xpose.msk.msra.mxu1 %vm1680_vm2, %v1330_v34 }
 0x209   :  { %1329 = vmatpush3.bf16.xpose.msk.msra.mxu0 %vm1680_vm2, %v1324_v35 }
 0x20a   :  { %v1336_v39 = vpack.c.bf16 %v1398_v37, %v1397_v38 }
 0x20c   :  { %1338 = vmatprep.subr.msk.bf16.mxu0 %vm1680_vm2, %v1336_v39 }
 0x20f   :  { %1262 = vmatmul.mubr.msk.f32.vlgmr.msra.gmra.mrb[2].mxu1 %vm186_vm1, %v175_v14 }
 0x210   :  { %1255 = vmatmul.mubr.msk.f32.vlgmr.msra.gmra.mrb[2].mxu0 %vm186_vm1, %v171_v18 }
 0x211   :  { %1341 = vmatpush3.bf16.xpose.msk.msra.mxu0 %vm1680_vm2, %v1336_v39  ;;  %1268 = vmatprep.mubr.msk.f32.mxu0 %vm186_vm1, %v177_v21 }
 0x218   :  { %1269 = vmatmul.mubr.msk.f32.vlgmr.msra.gmra.mrb[4].mxu0 %vm186_vm1, %v179_v20 }
 0x276   :  { %v1249_v42 = vpop.f32.mrb[0].mxu1 }
 0x277   :  { %v267_v43 = vadd.f32 %v1249_v42, %v181_v40  ;;  %v261_v44 = vpop.f32.mrb[1].mxu1 }
 0x278   :  { %v262_v45 = vadd.f32 %v261_v44, %v180_v41 }
 0x279   :  { %v535_v46 = vsel %vm531_vm3, %v267_v43, -inf }
 0x27a   :  { %536 = vmax.xlane.f32.xlu1 %v535_v46  ;;  %v532_v47 = vsel %vm531_vm3, %v262_v45, -inf }
 0x27b   :  { %533 = vmax.xlane.f32.xlu0 %v532_v47 }
 0x2e2   :  { %v1263_v48 = vpop.f32.mrb[2].mxu1 }
 0x2e3   :  { %v1256_v49 = vpop.f32.mrb[2].mxu0  ;;  %v435_v50 = vpop.f32.mrb[3].mxu1  ;;  %v441_v57 = vadd.f32 %v1263_v48, %v181_v40 }
 0x2e4   :  { %v436_v51 = vadd.f32 %v435_v50, %v180_v41  ;;  %v348_v52 = vpop.f32.mrb[3].mxu0  ;;  %v354_v55 = vadd.f32 %v1256_v49, %v181_v40 }
 0x2e5   :  { %v349_v53 = vadd.f32 %v348_v52, %v180_v41  ;;  %v547_v0 = vsel %vm531_vm3, %v441_v57, -inf }
 0x2e6   :  { %v544_v54 = vsel %vm531_vm3, %v436_v51, -inf  ;;  %v541_v59 = vsel %vm531_vm3, %v354_v55, -inf }
 0x2e7   :  { %545 = vmax.xlane.f32.xlu1 %v544_v54  ;;  %v538_v56 = vsel %vm531_vm3, %v349_v53, -inf }
 0x2e8   :  { %539 = vmax.xlane.f32.xlu0 %v538_v56 }
 0x2eb   :  { %v1270_v58 = vpop.f32.mrb[4].mxu0 }
 0x2ec   :  { %v522_v60 = vpop.f32.mrb[5].mxu0  ;;  %542 = vmax.xlane.f32.xlu0 %v541_v59  ;;  %v528_v62 = vadd.f32 %v1270_v58, %v181_v40 }
 0x2ed   :  { %v1717_v61 = vadd.f32 %v522_v60, %v180_v41 }
 0x2ee   :  { %v553_v1 = vsel %vm531_vm3, %v528_v62, -inf }
 0x2ef   :  { %v550_v63 = vsel %vm531_vm3, %v1717_v61, -inf }
 0x2f0   :  { %551 = vmax.xlane.f32.xlu1 %v550_v63  ;;  %548 = vmax.xlane.f32.xlu0 %v547_v0 }
 0x2f4   :  { %554 = vmax.xlane.f32.xlu0 %v553_v1 }
 0x301   :  { %1400 = vrot.lane.b32.xlu1 %v1665_v13, %s1558_s7 }
 0x307   :  { %v537_v2 = vpop.xlane.xlu1 %536 }
 0x308   :  { %v557_v3 = vsub.f32 %v267_v43, %v537_v2  ;;  %v534_v5 = vpop.xlane.xlu0 %533 }
 0x309   :  { %v556_v6 = vsub.f32 %v262_v45, %v534_v5 }
 0x30a   :  { %v566_v4 = vmul.f32 1.442695, %v557_v3 }
 0x30b   :  { %v564_v7 = vmul.f32 1.442695, %v556_v6 }
 0x30c   :  { %1419 = vpow2.f32 %v566_v4 }
 0x30d   :  { %1421 = vpow2.f32 %v564_v7 }
 0x316   :  { %v1725_v8 = vpop.eup %1419 }
 0x317   :  { %v583_v9 = vsel %vm531_vm3, %v1725_v8, 0.0  ;;  %v1422_v10 = vpop.eup %1421 }
 0x318   :  { %584 = vadd.xlane.f32.xlu0 %v583_v9  ;;  %v580_v11 = vsel %vm531_vm3, %v1422_v10, 0.0 }
 0x325   :  { %581 = vadd.xlane.f32.xlu1 %v580_v11 }
 0x374   :  { %v546_v12 = vpop.xlane.xlu1 %545 }
 0x375   :  { %v560_v13 = vsub.f32 %v436_v51, %v546_v12  ;;  %v540_v14 = vpop.xlane.xlu0 %539 }
 0x376   :  { %v558_v15 = vsub.f32 %v349_v53, %v540_v14 }
 0x377   :  { %v572_v16 = vmul.f32 1.442695, %v560_v13 }
 0x378   :  { %v568_v18 = vmul.f32 1.442695, %v558_v15 }
 0x379   :  { %v543_v20 = vpop.xlane.xlu0 %542 }
 0x37a   :  { %1423 = vpow2.f32 %v568_v18  ;;  %v559_v21 = vsub.f32 %v354_v55, %v543_v20 }
 0x37b   :  { %1425 = vpow2.f32 %v572_v16 }
 0x37c   :  { %v570_v23 = vmul.f32 1.442695, %v559_v21 }
 0x37d   :  { %v552_v24 = vpop.xlane.xlu1 %551  ;;  %v549_v25 = vpop.xlane.xlu0 %548 }
 0x37e   :  { %1427 = vpow2.f32 %v570_v23  ;;  %v561_v26 = vsub.f32 %v441_v57, %v549_v25  ;;  %v562_v45 = vsub.f32 %v1717_v61, %v552_v24  ;;  %v999_v23 = vld [vmem:[#allocation7] sm:$0xff]  ;;  %v1000_v24 = vld [vmem:[#allocation7 + $0x8] sm:$0xff]  ;;  %v1001_v25 = vld [vmem:[#allocation7 + $0x10] sm:$0xff] }
 0x380   :  { %v574_v27 = vmul.f32 1.442695, %v561_v26  ;;  %v576_v46 = vmul.f32 1.442695, %v562_v45  ;;  %v1358_v26 = vpack.c.bf16 %v1000_v24, %v999_v23 }
 0x381   :  { %v1401_v28 = vpop.permute.xlu1 %1400  ;;  %v555_v29 = vpop.xlane.xlu0 %554 }
 0x382   :  { %v1403_v30 = vunpack.i.h.bf16 %v1401_v28  ;;  %v1402_v31 = vunpack.i.l.bf16 %v1401_v28  ;;  %v563_v32 = vsub.f32 %v528_v62, %v555_v29  ;;  %1429 = vpow2.f32 %v574_v27  ;;  %v1002_v27 = vld [vmem:[#allocation7 + $0x18] sm:$0xff]  ;;  %1359 = vmatprep.subr.bf16.mxu0 %v1358_v26 }
 0x383   :  { %v1362_v28 = vpack.c.bf16 %v1002_v27, %v1001_v25  ;;  %1361 = vmatpush3.bf16.msra.mxu0 %v1358_v26 }
 0x384   :  { %v1424_v33 = vpop.eup %1423  ;;  %v1342_v34 = vpack.c.bf16 %v1403_v30, %v1402_v31  ;;  %v578_v35 = vmul.f32 1.442695, %v563_v32 }
 0x385   :  { %v586_v36 = vsel %vm531_vm3, %v1424_v33, 0.0  ;;  %v1426_v37 = vpop.eup %1425  ;;  %1363 = vmatprep.subr.bf16.mxu0 %v1362_v28 }
 0x386   :  { %1431 = vpow2.f32 %v578_v35  ;;  %1343 = vmatprep.subr.bf16.mxu1 %v1342_v34  ;;  %587 = vadd.xlane.f32.xlu1 %v586_v36  ;;  %v592_v39 = vsel %vm531_vm3, %v1426_v37, 0.0 }
 0x387   :  { %1345 = vmatpush3.bf16.msra.mxu1 %v1342_v34  ;;  %1433 = vpow2.f32 %v576_v46  ;;  %1365 = vmatpush3.bf16.msra.mxu0 %v1362_v28 }
 0x388   :  { %v1428_v38 = vpop.eup %1427 }
 0x389   :  { %v589_v40 = vsel %vm531_vm3, %v1428_v38, 0.0 }
 0x38a   :  { %593 = vadd.xlane.f32.xlu1 %v592_v39  ;;  %590 = vadd.xlane.f32.xlu0 %v589_v40 }
 0x38c   :  { %v1430_v41 = vpop.eup %1429 }
 0x38d   :  { %v595_v42 = vsel %vm531_vm3, %v1430_v41, 0.0 }
 0x38e   :  { %596 = vadd.xlane.f32.xlu0 %v595_v42 }
 0x390   :  { %v1734_v43 = vpop.eup %1431 }
 0x391   :  { %v601_v44 = vsel %vm531_vm3, %v1734_v43, 0.0  ;;  %v1434_v49 = vpop.eup %1433 }
 0x392   :  { %602 = vadd.xlane.f32.xlu0 %v601_v44  ;;  %v598_v52 = vsel %vm531_vm3, %v1434_v49, 0.0 }
 0x39b   :  { %1410 = vrot.lane.b32.xlu1 %v1669_v17, %s1558_s7 }
 0x3a5   :  { %v585_v47 = vpop.xlane.xlu0 %584 }
 0x3a6   :  { %1435 = vrcp.f32 %v585_v47  ;;  %v1183_v47 = vld [vmem:[%s1798_s4] ss:$0 sm:$0xff] }
 0x3a8   :  { %1405 = vrot.lane.b32.xlu0 %v1671_v19, %s1558_s7 }
 0x3b0   :  { %v1436_v50 = vpop.eup %1435 }
 0x3b1   :  { %v613_v54 = vmul.f32 %v1436_v50, %v1725_v8 }
 0x3b2   :  { %v582_v48 = vpop.xlane.xlu1 %581 }
 0x3b3   :  { %1437 = vrcp.f32 %v582_v48 }
 0x3bd   :  { %v1438_v51 = vpop.eup %1437 }
 0x3be   :  { %v612_v53 = vmul.f32 %v1438_v51, %v1422_v10 }
 0x3bf   :  { %599 = vadd.xlane.f32.xlu1 %v598_v52 }
 0x3c0   :  { %1275 = vmatprep.mubr.msk.f32.mxu1 %vm531_vm3, %v612_v53 }
 0x3c1   :  { %1276 = vmatmul.mubr.msk.f32.vlgmr.msra.gmra.mrb[4].mxu1 %vm531_vm3, %v613_v54 }
 0x3d0   :  { %1415 = vrot.lane.b32.xlu1 %v1675_v22, %s1558_s7 }
 0x413   :  { %v588_v17 = vpop.xlane.xlu1 %587 }
 0x414   :  { %1439 = vrcp.f32 %v588_v17 }
 0x417   :  { %v591_v19 = vpop.xlane.xlu0 %590  ;;  %v594_v55 = vpop.xlane.xlu1 %593 }
 0x418   :  { %1441 = vrcp.f32 %v591_v19 }
 0x419   :  { %1443 = vrcp.f32 %v594_v55 }
 0x41b   :  { %v597_v56 = vpop.xlane.xlu0 %596  ;;  %v1411_v60 = vpop.permute.xlu1 %1410 }
 0x41c   :  { %1445 = vrcp.f32 %v597_v56  ;;  %v1413_v62 = vunpack.i.h.bf16 %v1411_v60  ;;  %v1412_v63 = vunpack.i.l.bf16 %v1411_v60 }
 0x41e   :  { %v1440_v57 = vpop.eup %1439  ;;  %v1350_v4 = vpack.c.bf16 %v1413_v62, %v1412_v63 }
 0x41f   :  { %v614_v58 = vmul.f32 %v1440_v57, %v1424_v33  ;;  %v603_v59 = vpop.xlane.xlu0 %602 }
 0x420   :  { %1447 = vrcp.f32 %v603_v59 }
 0x421   :  { %1282 = vmatprep.mubr.msk.f32.mxu1 %vm531_vm3, %v614_v58 }
 0x422   :  { %v1442_v2 = vpop.eup %1441 }
 0x423   :  { %v1406_v61 = vpop.permute.xlu0 %1405  ;;  %v1444_v3 = vpop.eup %1443  ;;  %v615_v5 = vmul.f32 %v1442_v2, %v1428_v38 }
 0x424   :  { %v1408_v0 = vunpack.i.h.bf16 %v1406_v61  ;;  %v1407_v1 = vunpack.i.l.bf16 %v1406_v61  ;;  %v616_v7 = vmul.f32 %v1444_v3, %v1426_v37 }
 0x426   :  { %v1346_v22 = vpack.c.bf16 %v1408_v0, %v1407_v1  ;;  %v1446_v6 = vpop.eup %1445 }
 0x427   :  { %v617_v8 = vmul.f32 %v1446_v6, %v1430_v41  ;;  %v1187_v6 = vld [vmem:[%s1800_s6] ss:$0 sm:$0xff] }
 0x428   :  { %1347 = vmatprep.subr.bf16.mxu1 %v1346_v22 }
 0x429   :  { %1349 = vmatpush3.bf16.msra.mxu1 %v1346_v22 }
 0x42a   :  { %1351 = vmatprep.subr.bf16.mxu1 %v1350_v4  ;;  %v1448_v14 = vpop.eup %1447 }
 0x42b   :  { %v619_v18 = vmul.f32 %v1448_v14, %v1734_v43 }
 0x42c   :  { %1283 = vmatmul.mubr.msk.f32.vlgmr.msra.gmra.mrb[6].mxu1 %vm531_vm3, %v615_v5 }
 0x42d   :  { %1353 = vmatpush3.bf16.msra.mxu1 %v1350_v4  ;;  %1289 = vmatprep.mubr.msk.f32.mxu1 %vm531_vm3, %v616_v7  ;;  %v1186_v4 = vld [vmem:[%s1799_s5] ss:$0 sm:$0xff] }
 0x430   :  { %1290 = vmatmul.mubr.msk.f32.vlgmr.msra.gmra.mrb[8].mxu1 %vm531_vm3, %v617_v8 }
 0x44c   :  { %v600_v9 = vpop.xlane.xlu1 %599 }
 0x44d   :  { %1449 = vrcp.f32 %v600_v9 }
 0x450   :  { %v1416_v10 = vpop.permute.xlu1 %1415 }
 0x451   :  { %v1418_v11 = vunpack.i.h.bf16 %v1416_v10  ;;  %v1417_v12 = vunpack.i.l.bf16 %v1416_v10 }
 0x453   :  { %v1354_v13 = vpack.c.bf16 %v1418_v11, %v1417_v12 }
 0x455   :  { %1355 = vmatprep.subr.bf16.mxu1 %v1354_v13 }
 0x456   :  { %1357 = vmatpush3.bf16.msra.mxu1 %v1354_v13 }
 0x457   :  { %v1450_v15 = vpop.eup %1449 }
 0x458   :  { %v618_v16 = vmul.f32 %v1450_v15, %v1434_v49 }
 0x45a   :  { %1296 = vmatprep.mubr.msk.f32.mxu1 %vm531_vm3, %v618_v16 }
 0x45b   :  { %1297 = vmatmul.mubr.msk.f32.vlgmr.msra.gmra.mrb[10].mxu1 %vm531_vm3, %v619_v18 }
 0x494   :  { %v1277_v20 = vpop.f32.mrb[4].mxu1 }
 0x495   :  { %v698_v21 = vpop.f32.mrb[5].mxu1 }
 0x4ff   :  { %v1284_v29 = vpop.f32.mrb[6].mxu1 }
 0x500   :  { %972 = vrot.lane.b32.xlu1 %v1284_v29, %s1552_s18  ;;  %v785_v30 = vpop.f32.mrb[7].mxu1 }
 0x501   :  { %970 = vrot.lane.b32.xlu0 %v785_v30, %s1552_s18 }
 0x503   :  { %v1291_v31 = vpop.f32.mrb[8].mxu1 }
 0x504   :  { %980 = vrot.lane.b32.xlu1 %v1291_v31, %s1559_s1  ;;  %v872_v32 = vpop.f32.mrb[9].mxu1 }
 0x505   :  { %978 = vrot.lane.b32.xlu0 %v872_v32, %s1559_s1 }
 0x52e   :  { %v1298_v33 = vpop.f32.mrb[10].mxu1 }
 0x52f   :  { %988 = vrot.lane.b32.xlu1 %v1298_v33, %s1560_s28  ;;  %v959_v34 = vpop.f32.mrb[11].mxu1 }
 0x530   :  { %986 = vrot.lane.b32.xlu0 %v959_v34, %s1560_s28 }
 0x572   :  { %v973_v35 = vpop.permute.xlu1 %972 }
 0x573   :  { %v971_v36 = vpop.permute.xlu0 %970  ;;  %v993_v41 = vsel %vm186_vm1, %v1277_v20, %v973_v35 }
 0x574   :  { %v992_v39 = vsel %vm186_vm1, %v698_v21, %v971_v36 }
 0x576   :  { %v981_v37 = vpop.permute.xlu1 %980 }
 0x577   :  { %v979_v38 = vpop.permute.xlu0 %978  ;;  %v995_v44 = vsel %vm531_vm3, %v993_v41, %v981_v37 }
 0x578   :  { %v994_v42 = vsel %vm531_vm3, %v992_v39, %v979_v38 }
 0x5a1   :  { %v989_v40 = vpop.permute.xlu1 %988 }
 0x5a2   :  { %v987_v43 = vpop.permute.xlu0 %986  ;;  %v998_v46 = vsel %vm996_vm4, %v995_v44, %v989_v40 }
 0x5a3   :  { %v997_v45 = vsel %vm996_vm4, %v994_v42, %v987_v43 }
 0x5a4   :  { %1307 = vmatprep.mubr.msk.f32.mxu0 %vm84_vm0, %v997_v45 }
 0x5a5   :  { %1308 = vmatmul.mubr.msk.f32.vlgmr.msra.gmra.mrb[6].mxu0 %vm84_vm0, %v998_v46 }
 0x678   :  { %v1309_v48 = vpop.f32.mrb[6].mxu0 }
 0x679   :  { %v1088_v49 = vadd.f32 %v1309_v48, %v1183_v47  ;;  %v1082_v50 = vpop.f32.mrb[7].mxu0 }
 0x67a   :  { %v1083_v51 = vadd.f32 %v1183_v47, %v1082_v50 }
 0x67b   :  { %v1094_v52 = vsel %vm84_vm0, %v1088_v49, 0.0 }
 0x67c   :  { %1095 = vadd.xlane.f32.xlu1 %v1094_v52  ;;  %v1091_v53 = vsel %vm84_vm0, %v1083_v51, 0.0 }
 0x67d   :  { %1092 = vadd.xlane.f32.xlu0 %v1091_v53 }
 0x709   :  { %v1096_v54 = vpop.xlane.xlu1 %1095 }
 0x70a   :  { %v1099_v17 = vmul.f32 0.03125, %v1096_v54  ;;  %v1093_v19 = vpop.xlane.xlu0 %1092 }
 0x70b   :  { %v1098_v55 = vmul.f32 0.03125, %v1093_v19 }
 0x70c   :  { %v1101_v56 = vsub.f32 %v1088_v49, %v1099_v17 }
 0x70d   :  { %v1100_v57 = vsub.f32 %v1083_v51, %v1098_v55 }
 0x70e   :  { %v1103_v60 = vmul.f32 %v1101_v56, %v1101_v56 }
 0x70f   :  { %v1102_v58 = vmul.f32 %v1100_v57, %v1100_v57 }
 0x710   :  { %v1107_v61 = vsel %vm84_vm0, %v1103_v60, 0.0 }
 0x711   :  { %v1104_v59 = vsel %vm84_vm0, %v1102_v58, 0.0 }
 0x712   :  { %1105 = vadd.xlane.f32.xlu0 %v1104_v59 }
 0x716   :  { %1108 = vadd.xlane.f32.xlu0 %v1107_v61 }
 0x79f   :  { %v1106_v62 = vpop.xlane.xlu0 %1105 }
 0x7a0   :  { %v1110_v63 = vmul.f32 0.03125, %v1106_v62 }
 0x7a2   :  { %v1112_v0 = vadd.f32 1e-05, %v1110_v63 }
 0x7a3   :  { %v1109_v1 = vpop.xlane.xlu0 %1108 }
 0x7a4   :  { %1451 = vrsqrt.f32 %v1112_v0  ;;  %v1111_v22 = vmul.f32 0.03125, %v1109_v1 }
 0x7a6   :  { %v1113_v2 = vadd.f32 1e-05, %v1111_v22 }
 0x7a8   :  { %1453 = vrsqrt.f32 %v1113_v2 }
 0x7ae   :  { %v1452_v3 = vpop.eup %1451 }
 0x7af   :  { %v1116_v5 = vmul.f32 %v1452_v3, %v1100_v57 }
 0x7b1   :  { %v1125_v7 = vmul.f32 %v1186_v4, %v1116_v5 }
 0x7b2   :  { %v1454_v8 = vpop.eup %1453 }
 0x7b3   :  { %v1117_v9 = vmul.f32 %v1454_v8, %v1101_v56  ;;  %v1134_v10 = vadd.f32 %v1187_v6, %v1125_v7 }
 0x7b5   :  { %v1126_v11 = vmul.f32 %v1186_v4, %v1117_v9  ;;  %1136 = vst.msk [vmem:[#allocation8] sm:$0xff] %vm84_vm0, %v1134_v10 }
 0x7b7   :  { %v1135_v12 = vadd.f32 %v1187_v6, %v1126_v11 }
 0x7b9   :  { %1137 = vst.msk [vmem:[#allocation8 + $0x8] sm:$0xff] %vm84_vm0, %v1135_v12 }
 0x7ba   :  { %1532 = shalt.err (!%p1529_p0)
}
 0x7bb   :  { %s1533_s19 = scalar_lea.hbm %s1802_s8, 256 }
 0x7bc   :  { %p1534_p1 = scmp.ne.s32.totalorder %s1802_s8, %s1533_s19  ;;  %p1537_p2 = scmp.lt.u32.totalorder %s1533_s19, %s1802_s8 }
 0x7be   :  { %p1539_p3 = pnand %p1537_p2, %p1534_p1 }
 0x7c0   :  { %1542 = shalt.err (!%p1539_p3)
}
 0x7c1   :  { %1149 = dma.vmem_to_hbm [thread:$0]  %s1144_s15, 256, %s1802_s8, [#allocation4], %s1551_s17, %s1551_s17, %s1552_s18  }
 0x7c2   :  { %1547 = dma.done.wait [#allocation4], 256  }
 0x7c3   :  { %1548 = vsyncadd [#allocation4], 4294967040 }
 0x7c4   :  { %1153 = vsyncpa [#allocation3], 1 }
 0x7c5   :  { %1154 = vsyncpa [#allocation6], 1 }
 0x7c6   :  { %1155 = vsyncpa [#allocation4], 1 }

</bundles_post_ra>
